<compile_context>
chip_gen: v7x
topology: tpu7x:2x2x1
jax: 0.10.0
libtpu: 0.0.40
codegen_flags: <defaults>
</compile_context>

<pallas_src>
import jax
import jax.numpy as jnp
from jax import lax
from jax.experimental import pallas as pl
from jax.experimental.pallas import tpu as pltpu

TM_MAX = 8192   # max batch tile (lanes); multiple of 256 (fills 256-wide MXU, 128-lane vregs)


def _round_up(x, m):
    return ((x + m - 1) // m) * m


def _choose_tile(n):
    """Pick the batch tile (lane width) for N samples."""
    if n <= 512:
        # One small block; nothing to shard.
        return _round_up(max(n, 1), 256)
    # Prefer an even number (>= 2) of blocks so a v7x megacore can shard the
    # "parallel" grid axis across its two TensorCores; cap the tile at TM_MAX.
    n_blocks = max(2, 2 * pl.cdiv(n, 2 * TM_MAX))
    return min(TM_MAX, _round_up(pl.cdiv(n, n_blocks), 256))


# ------------------------- Pallas regressor kernel --------------------------

def regressor_kernel(x_ref, w1, w2, w3, c, o_ref):
    # x_ref: (32, TM) -- features on sublanes, batch on lanes.
    # c: packed constants (264, 1): b1[0:128], b2[128:192], b3[192:224],
    #    b4[224], w4[232:264].
    x = x_ref[...]
    h = jnp.dot(w1[...], x, preferred_element_type=jnp.float32) + c[0:128, :]
    h = jnp.maximum(h, 0.0)                                     # (128, TM)
    h = jnp.dot(w2[...], h, preferred_element_type=jnp.float32) + c[128:192, :]
    h = jnp.maximum(h, 0.0)                                     # (64, TM)
    h = jnp.dot(w3[...], h, preferred_element_type=jnp.float32) + c[192:224, :]
    h = jnp.maximum(h, 0.0)                                     # (32, TM)
    # Final Linear(32,1): VPU multiply + sublane reduce (XLU) -> lane-dense (1, TM).
    out = jnp.sum(h * c[232:264, :], axis=0, keepdims=True) + c[224:225, :]
    o_ref[...] = out.astype(o_ref.dtype)


def regressor_pallas(x_t, params):
    """x_t: (32, N) float32 (features, batch) -> (N, 1) float32 via the fused MLP."""
    w1, w2, w3, c = params
    d, n = x_t.shape
    tm = _choose_tile(n)
    n_blocks = pl.cdiv(n, tm)

    def resident(shape):  # whole array, block index constant -> loaded once
        return pl.BlockSpec(shape, lambda i: (0, 0))

    out = pl.pallas_call(
        regressor_kernel,
        # Flat lane-dense output row: block dim 1 == array dim 1 satisfies the
        # (8,128) rule for any n_blocks; stores are unmasked full-width vst.
        out_shape=jax.ShapeDtypeStruct((1, n_blocks * tm), jnp.float32),
        grid_spec=pltpu.PrefetchScalarGridSpec(
            num_scalar_prefetch=0,
            grid=(n_blocks,),
            in_specs=[
                pl.BlockSpec((d, tm), lambda i: (0, i)),   # batch tile on lanes
                resident(w1.shape), resident(w2.shape), resident(w3.shape),
                resident(c.shape),
            ],
            out_specs=pl.BlockSpec((1, tm), lambda i: (0, i)),
        ),
        compiler_params=pltpu.CompilerParams(
            dimension_semantics=("parallel",)),
    )(x_t, w1, w2, w3, c)
    return out[0, :n][:, None]


# ----------------------- synthetic encoder (plain JAX glue) -----------------

def encoder_encode(x, enc_params):
    """Stand-in for encoder.encode(x, len(encoder_layers)-1): NCHW -> (32, N)."""
    (k1, cb1), (k2, cb2) = enc_params
    dn = ("NCHW", "OIHW", "NCHW")
    y = lax.conv_general_dilated(x, k1, window_strides=(2, 2), padding="SAME",
                                 dimension_numbers=dn) + cb1[None, :, None, None]
    y = jnp.maximum(y, 0.0)
    y = lax.conv_general_dilated(y, k2, window_strides=(2, 2), padding="SAME",
                                 dimension_numbers=dn) + cb2[None, :, None, None]
    y = jnp.maximum(y, 0.0)
    # Global average pool emitted directly in (C, N) layout (batch on lanes) --
    # avoids a separate wrapper-side transpose/relayout pass through HBM.
    hh, ww = y.shape[2], y.shape[3]
    return jnp.einsum("nchw->cn", y) * (1.0 / (hh * ww))   # (32, N)


# ----------------------------- parameter init -------------------------------

def init_linear(key, fan_in, fan_out):
    kw, kb = jax.random.split(key)
    bound = 1.0 / jnp.sqrt(jnp.float32(fan_in))
    w = jax.random.uniform(kw, (fan_out, fan_in), jnp.float32, -bound, bound)  # PyTorch layout
    b = jax.random.uniform(kb, (fan_out,), jnp.float32, -bound, bound)
    return w, b


def init_conv(key, c_in, c_out, k=3):
    kw, kb = jax.random.split(key)
    fan_in = c_in * k * k
    bound = 1.0 / jnp.sqrt(jnp.float32(fan_in))
    w = jax.random.uniform(kw, (c_out, c_in, k, k), jnp.float32, -bound, bound)
    b = jax.random.uniform(kb, (c_out,), jnp.float32, -bound, bound)
    return w, b


def init_params(key):
    keys = jax.random.split(key, 6)
    enc_params = (init_conv(keys[0], 4, 16), init_conv(keys[1], 16, 32))
    w1, b1 = init_linear(keys[2], 32, 128)    # (128, 32)
    w2, b2 = init_linear(keys[3], 128, 64)    # (64, 128)
    w3, b3 = init_linear(keys[4], 64, 32)     # (32, 64)
    w4, b4 = init_linear(keys[5], 32, 1)      # (1, 32)
    # Pack all biases + the final-layer weight vector into one (264, 1) column:
    #   rows 0:128 b1 | 128:192 b2 | 192:224 b3 | 224 b4 | 232:264 w4
    c = jnp.zeros((264, 1), jnp.float32)
    c = c.at[0:128, 0].set(b1)
    c = c.at[128:192, 0].set(b2)
    c = c.at[192:224, 0].set(b3)
    c = c.at[224, 0].set(b4[0])
    c = c.at[232:264, 0].set(w4[0, :])
    reg_params = (w1, w2, w3, c)
    return enc_params, reg_params


# ---------------------------- full forward pass ------------------------------

def cnn_regressor_forward(x, enc_params, reg_params):
    encoded_t = encoder_encode(x, enc_params)        # (32, N), batch on lanes
    return regressor_pallas(encoded_t, reg_params)   # (N, 1)


def regressor_reference(x, params):
    """x: (N, 32) -> (N, 1), pure-JAX reference in standard row-major orientation."""
    w1, w2, w3, c = params
    b1 = c[0:128, 0]
    b2 = c[128:192, 0]
    b3 = c[192:224, 0]
    b4 = c[224, 0]
    w4 = c[232:264, 0]
    h = jnp.maximum(x @ w1.T + b1, 0.0)
    h = jnp.maximum(h @ w2.T + b2, 0.0)
    h = jnp.maximum(h @ w3.T + b3, 0.0)
    return h @ w4[:, None] + b4


if __name__ == "__main__":
    key = jax.random.PRNGKey(0)
    k_x, k_p, k_big = jax.random.split(key, 3)

    x = jax.random.normal(k_x, (2, 4, 16, 16), jnp.float32)   # NCHW
    enc_params, reg_params = init_params(k_p)

    forward = jax.jit(cnn_regressor_forward)
    out = forward(x, enc_params, reg_params)
    out = jax.block_until_ready(out)
    assert out.shape == (2, 1), out.shape

    # correctness check of the fused Pallas MLP against a pure-JAX reference
    encoded_t = encoder_encode(x, enc_params)          # (32, N)
    ref = regressor_reference(encoded_t.T, reg_params)
    assert jnp.allclose(out, ref, atol=1e-4, rtol=1e-4), (out, ref)

    # also exercise the multi-block (v7x dual-TC) path with a ragged last tile
    feats_big = jax.random.normal(k_big, (32, 640), jnp.float32)
    out_big = jax.block_until_ready(regressor_pallas(feats_big, reg_params))
    ref_big = regressor_reference(feats_big.T, reg_params)
    assert out_big.shape == (640, 1), out_big.shape
    assert jnp.allclose(out_big, ref_big, atol=1e-4, rtol=1e-4)

    print("KERNEL_OK")
</pallas_src>

<mosaic_0001>
module attributes {stable_mosaic.version = 11 : i64} {
  func.func @regressor_kernel(%arg0: i32, %arg1: memref<32x256xf32, #tpu.memory_space<vmem>>, %arg2: memref<128x32xf32, #tpu.memory_space<vmem>>, %arg3: memref<64x128xf32, #tpu.memory_space<vmem>>, %arg4: memref<32x64xf32, #tpu.memory_space<vmem>>, %arg5: memref<264x1xf32, #tpu.memory_space<vmem>>, %arg6: memref<1x256xf32, #tpu.memory_space<vmem>>) attributes {dimension_semantics = [#tpu.dimension_semantics<parallel>], iteration_bounds = array<i64: 1>, scalar_prefetch = 0 : i64, scratch_operands = 0 : i64, tpu.core_type = #tpu.core_type<tc>, window_params = [{transform_indices = @transform_0, window_bounds = array<i64: 32, 256>}, {pipeline_mode = #tpu.pipeline_mode<synchronous>, transform_indices = @transform_1, window_bounds = array<i64: 128, 32>}, {pipeline_mode = #tpu.pipeline_mode<synchronous>, transform_indices = @transform_2, window_bounds = array<i64: 64, 128>}, {pipeline_mode = #tpu.pipeline_mode<synchronous>, transform_indices = @transform_3, window_bounds = array<i64: 32, 64>}, {pipeline_mode = #tpu.pipeline_mode<synchronous>, transform_indices = @transform_4, window_bounds = array<i64: 264, 1>}, {transform_indices = @transform_5, window_bounds = array<i64: 1, 256>}]} {
    %c0 = arith.constant 0 : index
    %c0_0 = arith.constant 0 : index
    %0 = vector.load %arg1[%c0, %c0_0] : memref<32x256xf32, #tpu.memory_space<vmem>>, vector<32x256xf32>
    %c0_1 = arith.constant 0 : index
    %c0_2 = arith.constant 0 : index
    %1 = vector.load %arg2[%c0_1, %c0_2] : memref<128x32xf32, #tpu.memory_space<vmem>>, vector<128x32xf32>
    %cst = arith.constant dense<0.000000e+00> : vector<128x256xf32>
    %2 = tpu.matmul %1, %0, %cst {dimension_numbers = #tpu.dot_dimension_numbers<[1], [0], [0], [1], [0, 0, 1, 1], [], []>} : vector<128x32xf32>, vector<32x256xf32>, vector<128x256xf32> -> vector<128x256xf32>
    %c0_3 = arith.constant 0 : index
    %c0_4 = arith.constant 0 : index
    %3 = vector.load %arg5[%c0_3, %c0_4] : memref<264x1xf32, #tpu.memory_space<vmem>>, vector<128x1xf32>
    %4 = vector.broadcast %3 : vector<128x1xf32> to vector<128x256xf32>
    %5 = arith.addf %2, %4 : vector<128x256xf32>
    %cst_5 = arith.constant 0.000000e+00 : f32
    %6 = vector.broadcast %cst_5 : f32 to vector<128x256xf32>
    %7 = arith.maximumf %5, %6 : vector<128x256xf32>
    %c0_6 = arith.constant 0 : index
    %c0_7 = arith.constant 0 : index
    %8 = vector.load %arg3[%c0_6, %c0_7] : memref<64x128xf32, #tpu.memory_space<vmem>>, vector<64x128xf32>
    %cst_8 = arith.constant dense<0.000000e+00> : vector<64x256xf32>
    %9 = tpu.matmul %8, %7, %cst_8 {dimension_numbers = #tpu.dot_dimension_numbers<[1], [0], [0], [1], [0, 0, 1, 1], [], []>} : vector<64x128xf32>, vector<128x256xf32>, vector<64x256xf32> -> vector<64x256xf32>
    %c128 = arith.constant 128 : index
    %c0_9 = arith.constant 0 : index
    %10 = vector.load %arg5[%c128, %c0_9] : memref<264x1xf32, #tpu.memory_space<vmem>>, vector<64x1xf32>
    %11 = vector.broadcast %10 : vector<64x1xf32> to vector<64x256xf32>
    %12 = arith.addf %9, %11 : vector<64x256xf32>
    %cst_10 = arith.constant 0.000000e+00 : f32
    %13 = vector.broadcast %cst_10 : f32 to vector<64x256xf32>
    %14 = arith.maximumf %12, %13 : vector<64x256xf32>
    %c0_11 = arith.constant 0 : index
    %c0_12 = arith.constant 0 : index
    %15 = vector.load %arg4[%c0_11, %c0_12] : memref<32x64xf32, #tpu.memory_space<vmem>>, vector<32x64xf32>
    %cst_13 = arith.constant dense<0.000000e+00> : vector<32x256xf32>
    %16 = tpu.matmul %15, %14, %cst_13 {dimension_numbers = #tpu.dot_dimension_numbers<[1], [0], [0], [1], [0, 0, 1, 1], [], []>} : vector<32x64xf32>, vector<64x256xf32>, vector<32x256xf32> -> vector<32x256xf32>
    %c192 = arith.constant 192 : index
    %c0_14 = arith.constant 0 : index
    %17 = vector.load %arg5[%c192, %c0_14] : memref<264x1xf32, #tpu.memory_space<vmem>>, vector<32x1xf32>
    %18 = vector.broadcast %17 : vector<32x1xf32> to vector<32x256xf32>
    %19 = arith.addf %16, %18 : vector<32x256xf32>
    %cst_15 = arith.constant 0.000000e+00 : f32
    %20 = vector.broadcast %cst_15 : f32 to vector<32x256xf32>
    %21 = arith.maximumf %19, %20 : vector<32x256xf32>
    %c232 = arith.constant 232 : index
    %c0_16 = arith.constant 0 : index
    %22 = vector.load %arg5[%c232, %c0_16] : memref<264x1xf32, #tpu.memory_space<vmem>>, vector<32x1xf32>
    %23 = vector.broadcast %22 : vector<32x1xf32> to vector<32x256xf32>
    %24 = arith.mulf %21, %23 : vector<32x256xf32>
    %cst_17 = arith.constant dense<0.000000e+00> : vector<256xf32>
    %25 = vector.multi_reduction <add>, %24, %cst_17 [0] : vector<32x256xf32> to vector<256xf32>
    %26 = vector.shape_cast %25 : vector<256xf32> to vector<1x256xf32>
    %c224 = arith.constant 224 : index
    %c0_18 = arith.constant 0 : index
    %27 = vector.load %arg5[%c224, %c0_18] : memref<264x1xf32, #tpu.memory_space<vmem>>, vector<1x1xf32>
    %28 = vector.broadcast %27 : vector<1x1xf32> to vector<1x256xf32>
    %29 = arith.addf %26, %28 : vector<1x256xf32>
    %c0_19 = arith.constant 0 : index
    %c0_20 = arith.constant 0 : index
    %30 = vector.load %arg6[%c0_19, %c0_20] : memref<1x256xf32, #tpu.memory_space<vmem>>, vector<1x256xf32>
    tpu.vector_store %arg6[%c0_19, %c0_20], %29 {strides = array<i32>} : memref<1x256xf32, #tpu.memory_space<vmem>>, vector<1x256xf32>,
    return
  }
  func.func @transform_0(%arg0: i32) -> (i32, i32) {
    %c0_i32 = arith.constant 0 : i32
    %c0_i32_0 = arith.constant 0 : i32
    return %c0_i32, %arg0 : i32, i32
  }
  func.func @transform_1(%arg0: i32) -> (i32, i32) {
    %c0_i32 = arith.constant 0 : i32
    %c0_i32_0 = arith.constant 0 : i32
    %c0_i32_1 = arith.constant 0 : i32
    return %c0_i32, %c0_i32_0 : i32, i32
  }
  func.func @transform_2(%arg0: i32) -> (i32, i32) {
    %c0_i32 = arith.constant 0 : i32
    %c0_i32_0 = arith.constant 0 : i32
    %c0_i32_1 = arith.constant 0 : i32
    return %c0_i32, %c0_i32_0 : i32, i32
  }
  func.func @transform_3(%arg0: i32) -> (i32, i32) {
    %c0_i32 = arith.constant 0 : i32
    %c0_i32_0 = arith.constant 0 : i32
    %c0_i32_1 = arith.constant 0 : i32
    return %c0_i32, %c0_i32_0 : i32, i32
  }
  func.func @transform_4(%arg0: i32) -> (i32, i32) {
    %c0_i32 = arith.constant 0 : i32
    %c0_i32_0 = arith.constant 0 : i32
    %c0_i32_1 = arith.constant 0 : i32
    return %c0_i32, %c0_i32_0 : i32, i32
  }
  func.func @transform_5(%arg0: i32) -> (i32, i32) {
    %c0_i32 = arith.constant 0 : i32
    %c0_i32_0 = arith.constant 0 : i32
    return %c0_i32, %arg0 : i32, i32
  }
}

</mosaic_0001>

<bundles_post_ra>
// kernel: cnn_regressor_forward.1
= control target key start
LH: loop header
LB: loop body
LE: loop exit
PB: predicated region body
PF: predicated region fallthrough
CT: control target
= control target key end

     0   :  { %v67_v0 = vld [vmem:[#allocation2 + $0x8] sm:$0xff]  ;;  %v69_v1 = vld [vmem:[#allocation2 + $0x18] sm:$0xff]  ;;  %v937_v7 = vmov 0.0   ;;  %v938_v8 = vmov 0   ;;  %vm186_vm0 = vcmask 261120   ;;  %vm641_vm1 = vcmask 523264   ;;  %s1212_s0 = inlined_call_operand.vmem [shape: f32[32,2], index: 0, kind: input, shape index: {}]   ;;  %s1213_s1 = inlined_call_operand.vmem [shape: f32[128,32], index: 1, kind: input, shape index: {}]   ;;  %s1214_s2 = inlined_call_operand.vmem [shape: f32[64,128], index: 2, kind: input, shape index: {}]   ;;  %s1215_s3 = inlined_call_operand.vmem [shape: f32[32,64], index: 3, kind: input, shape index: {}]   ;;  %s1216_s4 = inlined_call_operand.vmem [shape: f32[264,1], index: 4, kind: input, shape index: {}]   ;;  %s1217_s5 = inlined_call_operand.vmem [shape: f32[1,256], index: 5, kind: output, shape index: {}]  }
   0x1   :  { %v45_v2 = vld [vmem:[%s1212_s0] sm:$0xff]  ;;  %v860_v3 = vpack.c.bf16 %v69_v1, %v67_v0  ;;  %v47_v4 = vld [vmem:[%s1212_s0 + $0x8] sm:$0xff]  ;;  %v73_v6 = vld [vmem:[#allocation2 + $0x38] sm:$0xff]  ;;  %299 = vmatprep.mubr.f32.mxu0 %v937_v7  ;;  %935 = vset.pattern.permute.xlu0 %v938_v8 }
   0x2   :  { %v71_v5 = vld [vmem:[#allocation2 + $0x28] sm:$0xff]  ;;  %v862_v9 = vpack.c.bf16 %v47_v4, %v45_v2  ;;  %v49_v11 = vld [vmem:[%s1212_s0 + $0x10] sm:$0xff]  ;;  %v51_v12 = vld [vmem:[%s1212_s0 + $0x18] sm:$0xff]  ;;  %936 = vset.pattern.permute.xlu1 %v938_v8  ;;  %554 = vmatprep.mubr.f32.mxu1 %v937_v7 }
   0x3   :  { %v864_v10 = vpack.c.bf16 %v73_v6, %v71_v5  ;;  %861 = vmatprep.subr.bf16.mxu0 %v860_v3  ;;  %v866_v13 = vpack.c.bf16 %v51_v12, %v49_v11  ;;  %v90_v14 = vld [vmem:[%s1216_s4] sm:$0xff]  ;;  %v91_v15 = vld [vmem:[%s1216_s4 + $0x8] sm:$0xff]  ;;  %v92_v16 = vld [vmem:[%s1216_s4 + $0x10] sm:$0xff] }
   0x4   :  { %863 = vmatpush1.bf16.msra.mxu0 %v862_v9  ;;  %108 = vperm.xlu0 %935, %v90_v14   ;;  %v74_v17 = vld [vmem:[%s1213_s1] sm:$0xff]  ;;  %v93_v18 = vld [vmem:[%s1216_s4 + $0x18] sm:$0xff]  ;;  %v75_v20 = vld [vmem:[%s1213_s1 + $0x8] sm:$0xff] }
   0x5   :  { %865 = vmatprep.subr.bf16.mxu0 %v864_v10  ;;  %118 = vperm.xlu1 %936, %v92_v16   ;;  %v94_v19 = vld [vmem:[%s1216_s4 + $0x20] sm:$0xff]  ;;  %v95_v21 = vld [vmem:[%s1216_s4 + $0x28] sm:$0xff]  ;;  %v96_v22 = vld [vmem:[%s1216_s4 + $0x30] sm:$0xff] }
   0x6   :  { %v76_v23 = vld [vmem:[%s1213_s1 + $0x10] sm:$0xff]  ;;  %v97_v24 = vld [vmem:[%s1216_s4 + $0x38] sm:$0xff]  ;;  %v98_v25 = vld [vmem:[%s1216_s4 + $0x40] sm:$0xff] }
   0x7   :  { %v77_v26 = vld [vmem:[%s1213_s1 + $0x18] sm:$0xff]  ;;  %v99_v27 = vld [vmem:[%s1216_s4 + $0x48] sm:$0xff]  ;;  %v100_v28 = vld [vmem:[%s1216_s4 + $0x50] sm:$0xff] }
   0x8   :  { %867 = vmatpush1.bf16.msra.mxu0 %v866_v13  ;;  %113 = vperm.xlu0 %935, %v91_v15   ;;  %v78_v29 = vld [vmem:[%s1213_s1 + $0x20] sm:$0xff]  ;;  %v101_v30 = vld [vmem:[%s1216_s4 + $0x58] sm:$0xff]  ;;  %v79_v32 = vld [vmem:[%s1213_s1 + $0x28] sm:$0xff] }
   0x9   :  { %123 = vperm.xlu1 %936, %v93_v18   ;;  %v102_v31 = vld [vmem:[%s1216_s4 + $0x60] sm:$0xff]  ;;  %v103_v33 = vld [vmem:[%s1216_s4 + $0x68] sm:$0xff]  ;;  %v104_v34 = vld [vmem:[%s1216_s4 + $0x70] sm:$0xff] }
   0xa   :  { %v80_v35 = vld [vmem:[%s1213_s1 + $0x30] sm:$0xff]  ;;  %v105_v36 = vld [vmem:[%s1216_s4 + $0x78] sm:$0xff]  ;;  %v436_v37 = vld [vmem:[%s1216_s4 + $0x80] sm:$0xff] }
   0xb   :  { %840 = vmatmul.mubr.msk.f32.vlgmr.msra.gmra.mrb[0].mxu0 %vm186_vm0, %v74_v17  ;;  %v81_v38 = vld [vmem:[%s1213_s1 + $0x38] sm:$0xff]  ;;  %v437_v39 = vld [vmem:[%s1216_s4 + $0x88] sm:$0xff]  ;;  %v438_v40 = vld [vmem:[%s1216_s4 + $0x90] sm:$0xff] }
   0xc   :  { %305 = vmatprep.mubr.f32.mxu0 %v937_v7  ;;  %128 = vperm.xlu0 %935, %v94_v19   ;;  %v82_v41 = vld [vmem:[%s1213_s1 + $0x40] sm:$0xff]  ;;  %v439_v42 = vld [vmem:[%s1216_s4 + $0x98] sm:$0xff]  ;;  %v83_v44 = vld [vmem:[%s1213_s1 + $0x48] sm:$0xff] }
   0xd   :  { %133 = vperm.xlu1 %936, %v95_v21   ;;  %v440_v43 = vld [vmem:[%s1216_s4 + $0xa0] sm:$0xff]  ;;  %v441_v45 = vld [vmem:[%s1216_s4 + $0xa8] sm:$0xff]  ;;  %v442_v46 = vld [vmem:[%s1216_s4 + $0xb0] sm:$0xff] }
   0xe   :  { %v84_v47 = vld [vmem:[%s1213_s1 + $0x50] sm:$0xff]  ;;  %v443_v48 = vld [vmem:[%s1216_s4 + $0xb8] sm:$0xff]  ;;  %v617_v49 = vld [vmem:[%s1216_s4 + $0xc0] sm:$0xff] }
   0xf   :  { %841 = vmatmul.mubr.msk.f32.gmra.mrb[2].mxu0 %vm186_vm0, %v75_v20  ;;  %v85_v50 = vld [vmem:[%s1213_s1 + $0x58] sm:$0xff]  ;;  %v618_v51 = vld [vmem:[%s1216_s4 + $0xc8] sm:$0xff]  ;;  %v619_v52 = vld [vmem:[%s1216_s4 + $0xd0] sm:$0xff] }
  0x10   :  { %311 = vmatprep.mubr.f32.mxu0 %v937_v7  ;;  %138 = vperm.xlu0 %935, %v96_v22   ;;  %v86_v53 = vld [vmem:[%s1213_s1 + $0x60] sm:$0xff]  ;;  %v620_v54 = vld [vmem:[%s1216_s4 + $0xd8] sm:$0xff]  ;;  %v751_v55 = vld [vmem:[%s1216_s4 + $0xe8] sm:$0xff] }
  0x11   :  { %143 = vperm.xlu1 %936, %v97_v24   ;;  %v87_v56 = vld [vmem:[%s1213_s1 + $0x68] sm:$0xff]  ;;  %v752_v57 = vld [vmem:[%s1216_s4 + $0xf0] sm:$0xff]  ;;  %v753_v58 = vld [vmem:[%s1216_s4 + $0xf8] sm:$0xff] }
  0x12   :  { %v88_v59 = vld [vmem:[%s1213_s1 + $0x70] sm:$0xff]  ;;  %v754_v60 = vld [vmem:[%s1216_s4 + $0x100] sm:$0xff]  ;;  %v89_v62 = vld [vmem:[%s1213_s1 + $0x78] sm:$0xff] }
  0x13   :  { %842 = vmatmul.mubr.msk.f32.gmra.mrb[4].mxu0 %vm186_vm0, %v76_v23  ;;  %v801_v61 = vld [vmem:[%s1216_s4 + $0xe0] sm:$0x1] }
  0x14   :  { %317 = vmatprep.mubr.f32.mxu0 %v937_v7  ;;  %148 = vperm.xlu0 %935, %v98_v25  }
  0x15   :  { %153 = vperm.xlu1 %936, %v99_v27  }
  0x17   :  { %843 = vmatmul.mubr.msk.f32.gmra.mrb[6].mxu0 %vm186_vm0, %v77_v26 }
  0x18   :  { %323 = vmatprep.mubr.f32.mxu0 %v937_v7  ;;  %158 = vperm.xlu0 %935, %v100_v28  }
  0x19   :  { %163 = vperm.xlu1 %936, %v101_v30  }
  0x1b   :  { %844 = vmatmul.mubr.msk.f32.gmra.mrb[8].mxu0 %vm186_vm0, %v78_v29 }
  0x1c   :  { %329 = vmatprep.mubr.f32.mxu0 %v937_v7  ;;  %168 = vperm.xlu0 %935, %v102_v31  }
  0x1d   :  { %173 = vperm.xlu1 %936, %v103_v33  }
  0x1f   :  { %845 = vmatmul.mubr.msk.f32.gmra.mrb[10].mxu0 %vm186_vm0, %v79_v32 }
  0x20   :  { %335 = vmatprep.mubr.f32.mxu0 %v937_v7  ;;  %178 = vperm.xlu0 %935, %v104_v34  }
  0x21   :  { %183 = vperm.xlu1 %936, %v105_v36  }
  0x23   :  { %846 = vmatmul.mubr.msk.f32.gmra.mrb[12].mxu0 %vm186_vm0, %v80_v35 }
  0x24   :  { %341 = vmatprep.mubr.f32.mxu0 %v937_v7  ;;  %446 = vperm.xlu0 %935, %v436_v37  }
  0x25   :  { %451 = vperm.xlu1 %936, %v437_v39  }
  0x27   :  { %847 = vmatmul.mubr.msk.f32.gmra.mrb[14].mxu0 %vm186_vm0, %v81_v38 }
  0x28   :  { %347 = vmatprep.mubr.f32.mxu0 %v937_v7  ;;  %456 = vperm.xlu0 %935, %v438_v40  }
  0x29   :  { %461 = vperm.xlu1 %936, %v439_v42  }
  0x2b   :  { %848 = vmatmul.mubr.msk.f32.gmra.mrb[16].mxu0 %vm186_vm0, %v82_v41 }
  0x2c   :  { %353 = vmatprep.mubr.f32.mxu0 %v937_v7  ;;  %466 = vperm.xlu0 %935, %v440_v43  }
  0x2d   :  { %471 = vperm.xlu1 %936, %v441_v45  }
  0x2f   :  { %849 = vmatmul.mubr.msk.f32.gmra.mrb[18].mxu0 %vm186_vm0, %v83_v44 }
  0x30   :  { %359 = vmatprep.mubr.f32.mxu0 %v937_v7  ;;  %476 = vperm.xlu0 %935, %v442_v46  }
  0x31   :  { %481 = vperm.xlu1 %936, %v443_v48  }
  0x33   :  { %850 = vmatmul.mubr.msk.f32.gmra.mrb[20].mxu0 %vm186_vm0, %v84_v47 }
  0x34   :  { %365 = vmatprep.mubr.f32.mxu0 %v937_v7  ;;  %623 = vperm.xlu0 %935, %v617_v49  }
  0x35   :  { %628 = vperm.xlu1 %936, %v618_v51  }
  0x37   :  { %851 = vmatmul.mubr.msk.f32.gmra.mrb[22].mxu0 %vm186_vm0, %v85_v50 }
  0x38   :  { %371 = vmatprep.mubr.f32.mxu0 %v937_v7  ;;  %633 = vperm.xlu0 %935, %v619_v52  }
  0x39   :  { %638 = vperm.xlu1 %936, %v620_v54  }
  0x3b   :  { %852 = vmatmul.mubr.msk.f32.gmra.mrb[24].mxu0 %vm186_vm0, %v86_v53 }
  0x3c   :  { %377 = vmatprep.mubr.f32.mxu0 %v937_v7  ;;  %757 = vperm.xlu0 %935, %v751_v55  }
  0x3d   :  { %762 = vperm.xlu1 %936, %v752_v57  }
  0x3f   :  { %853 = vmatmul.mubr.msk.f32.gmra.mrb[26].mxu0 %vm186_vm0, %v87_v56 }
  0x40   :  { %383 = vmatprep.mubr.f32.mxu0 %v937_v7  ;;  %767 = vperm.xlu0 %935, %v753_v58  }
  0x41   :  { %772 = vperm.xlu1 %936, %v754_v60  }
  0x43   :  { %854 = vmatmul.mubr.msk.f32.gmra.mrb[28].mxu0 %vm186_vm0, %v88_v59 }
  0x44   :  { %389 = vmatprep.mubr.f32.mxu0 %v937_v7  ;;  %804 = vperm.xlu0 %935, %v801_v61  }
  0x47   :  { %855 = vmatmul.mubr.msk.f32.gmra.mrb[30].mxu0 %vm186_vm0, %v89_v62 }
  0x48   :  { %548 = vmatprep.mubr.f32.mxu0 %v937_v7 }
  0x83   :  { %v109_v63 = vpop.permute.xlu0 %108 }
  0x84   :  { %v119_v9 = vpop.permute.xlu1 %118 }
  0x87   :  { %v114_v3 = vpop.permute.xlu0 %113 }
  0x88   :  { %v124_v20 = vpop.permute.xlu1 %123 }
  0x8b   :  { %v129_v33 = vpop.permute.xlu0 %128 }
  0x8c   :  { %v134_v36 = vpop.permute.xlu1 %133 }
  0x8f   :  { %v139_v49 = vpop.permute.xlu0 %138 }
  0x90   :  { %v144_v52 = vpop.permute.xlu1 %143 }
  0xde   :  { %v301_v0 = vpop.f32.mrb[0].mxu0 }
  0xdf   :  { %v303_v1 = vpop.f32.mrb[1].mxu0  ;;  %v302_v2 = vadd.f32 %v301_v0, %v109_v63 }
  0xe0   :  { %v304_v4 = vadd.f32 %v303_v1, %v109_v63  ;;  %v149_v1 = vpop.permute.xlu0 %148 }
  0xe1   :  { %v396_v11 = vmax.f32 %v302_v2, 0.0 }
  0xe2   :  { %v307_v5 = vpop.f32.mrb[2].mxu0  ;;  %v397_v13 = vmax.f32 %v304_v4, 0.0  ;;  %v154_v4 = vpop.permute.xlu1 %153 }
  0xe3   :  { %v308_v6 = vadd.f32 %v307_v5, %v114_v3  ;;  %v309_v8 = vpop.f32.mrb[3].mxu0 }
  0xe4   :  { %v310_v10 = vadd.f32 %v309_v8, %v114_v3 }
  0xe5   :  { %v398_v12 = vmax.f32 %v308_v6, 0.0 }
  0xe6   :  { %v399_v14 = vmax.f32 %v310_v10, 0.0  ;;  %v313_v15 = vpop.f32.mrb[4].mxu0 }
  0xe7   :  { %v870_v16 = vpack.c.bf16 %v398_v12, %v396_v11  ;;  %v315_v17 = vpop.f32.mrb[5].mxu0  ;;  %v314_v19 = vadd.f32 %v313_v15, %v119_v9 }
  0xe8   :  { %v868_v18 = vpack.c.bf16 %v399_v14, %v397_v13  ;;  %v316_v21 = vadd.f32 %v315_v17, %v119_v9 }
  0xe9   :  { %v400_v26 = vmax.f32 %v314_v19, 0.0 }
  0xea   :  { %v319_v22 = vpop.f32.mrb[6].mxu0  ;;  %869 = vmatprep.subr.bf16.mxu0 %v868_v18  ;;  %916 = vmatprep.subr.bf16.mxu1 %v868_v18  ;;  %v401_v28 = vmax.f32 %v316_v21, 0.0  ;;  %v159_v18 = vpop.permute.xlu0 %158 }
  0xeb   :  { %v320_v23 = vadd.f32 %v319_v22, %v124_v20  ;;  %v321_v24 = vpop.f32.mrb[7].mxu0  ;;  %871 = vmatpush1.bf16.msra.mxu0 %v870_v16  ;;  %924 = vmatpush1.bf16.msra.mxu1 %v870_v16  ;;  %v164_v21 = vpop.permute.xlu1 %163 }
  0xec   :  { %v322_v25 = vadd.f32 %v321_v24, %v124_v20 }
  0xed   :  { %v402_v27 = vmax.f32 %v320_v23, 0.0 }
  0xee   :  { %v403_v29 = vmax.f32 %v322_v25, 0.0  ;;  %v325_v30 = vpop.f32.mrb[8].mxu0 }
  0xef   :  { %v874_v31 = vpack.c.bf16 %v402_v27, %v400_v26  ;;  %v327_v32 = vpop.f32.mrb[9].mxu0  ;;  %v326_v35 = vadd.f32 %v325_v30, %v129_v33 }
  0xf0   :  { %v872_v34 = vpack.c.bf16 %v403_v29, %v401_v28  ;;  %v328_v37 = vadd.f32 %v327_v32, %v129_v33 }
  0xf1   :  { %v404_v42 = vmax.f32 %v326_v35, 0.0 }
  0xf2   :  { %v331_v38 = vpop.f32.mrb[10].mxu0  ;;  %873 = vmatprep.subr.bf16.mxu0 %v872_v34  ;;  %917 = vmatprep.subr.bf16.mxu1 %v872_v34  ;;  %v405_v44 = vmax.f32 %v328_v37, 0.0  ;;  %v169_v34 = vpop.permute.xlu0 %168 }
  0xf3   :  { %v332_v39 = vadd.f32 %v331_v38, %v134_v36  ;;  %v333_v40 = vpop.f32.mrb[11].mxu0  ;;  %875 = vmatpush1.bf16.msra.mxu0 %v874_v31  ;;  %925 = vmatpush1.bf16.msra.mxu1 %v874_v31  ;;  %v174_v37 = vpop.permute.xlu1 %173 }
  0xf4   :  { %v334_v41 = vadd.f32 %v333_v40, %v134_v36 }
  0xf5   :  { %v406_v43 = vmax.f32 %v332_v39, 0.0 }
  0xf6   :  { %v407_v45 = vmax.f32 %v334_v41, 0.0  ;;  %v337_v46 = vpop.f32.mrb[12].mxu0 }
  0xf7   :  { %v878_v47 = vpack.c.bf16 %v406_v43, %v404_v42  ;;  %v339_v48 = vpop.f32.mrb[13].mxu0  ;;  %v338_v51 = vadd.f32 %v337_v46, %v139_v49 }
  0xf8   :  { %v876_v50 = vpack.c.bf16 %v407_v45, %v405_v44  ;;  %v340_v53 = vadd.f32 %v339_v48, %v139_v49 }
  0xf9   :  { %v408_v58 = vmax.f32 %v338_v51, 0.0 }
  0xfa   :  { %v343_v54 = vpop.f32.mrb[14].mxu0  ;;  %877 = vmatprep.subr.bf16.mxu0 %v876_v50  ;;  %918 = vmatprep.subr.bf16.mxu1 %v876_v50  ;;  %v409_v60 = vmax.f32 %v340_v53, 0.0  ;;  %v179_v50 = vpop.permute.xlu0 %178 }
  0xfb   :  { %v344_v55 = vadd.f32 %v343_v54, %v144_v52  ;;  %v345_v56 = vpop.f32.mrb[15].mxu0  ;;  %879 = vmatpush1.bf16.msra.mxu0 %v878_v47  ;;  %926 = vmatpush1.bf16.msra.mxu1 %v878_v47  ;;  %v184_v53 = vpop.permute.xlu1 %183 }
  0xfc   :  { %v346_v57 = vadd.f32 %v345_v56, %v144_v52 }
  0xfd   :  { %v410_v59 = vmax.f32 %v344_v55, 0.0 }
  0xfe   :  { %v411_v61 = vmax.f32 %v346_v57, 0.0  ;;  %v349_v62 = vpop.f32.mrb[16].mxu0 }
  0xff   :  { %v882_v63 = vpack.c.bf16 %v410_v59, %v408_v58  ;;  %v351_v0 = vpop.f32.mrb[17].mxu0  ;;  %v350_v3 = vadd.f32 %v349_v62, %v149_v1 }
 0x100   :  { %v880_v2 = vpack.c.bf16 %v411_v61, %v409_v60  ;;  %v352_v5 = vadd.f32 %v351_v0, %v149_v1  ;;  %v428_v1 = vld [vmem:[%s1214_s2] sm:$0xff] }
 0x101   :  { %v412_v11 = vmax.f32 %v350_v3, 0.0  ;;  %v430_v3 = vld [vmem:[%s1214_s2 + $0x10] sm:$0xff] }
 0x102   :  { %v355_v6 = vpop.f32.mrb[18].mxu0  ;;  %881 = vmatprep.subr.bf16.mxu0 %v880_v2  ;;  %919 = vmatprep.subr.bf16.mxu1 %v880_v2  ;;  %v413_v13 = vmax.f32 %v352_v5, 0.0  ;;  %v429_v2 = vld [vmem:[%s1214_s2 + $0x8] sm:$0xff]  ;;  %v432_v5 = vld [vmem:[%s1214_s2 + $0x20] sm:$0xff] }
 0x103   :  { %v356_v8 = vadd.f32 %v355_v6, %v154_v4  ;;  %v357_v9 = vpop.f32.mrb[19].mxu0  ;;  %883 = vmatpush1.bf16.msra.mxu0 %v882_v63  ;;  %927 = vmatpush1.bf16.msra.mxu1 %v882_v63  ;;  %v433_v6 = vld [vmem:[%s1214_s2 + $0x28] sm:$0xff] }
 0x104   :  { %v358_v10 = vadd.f32 %v357_v9, %v154_v4  ;;  %v431_v4 = vld [vmem:[%s1214_s2 + $0x18] sm:$0xff] }
 0x105   :  { %v414_v12 = vmax.f32 %v356_v8, 0.0  ;;  %v434_v8 = vld [vmem:[%s1214_s2 + $0x30] sm:$0xff]  ;;  %v435_v9 = vld [vmem:[%s1214_s2 + $0x38] sm:$0xff] }
 0x106   :  { %v415_v14 = vmax.f32 %v358_v10, 0.0  ;;  %v361_v15 = vpop.f32.mrb[20].mxu0  ;;  %v447_v10 = vpop.permute.xlu0 %446 }
 0x107   :  { %v886_v16 = vpack.c.bf16 %v414_v12, %v412_v11  ;;  %v363_v17 = vpop.f32.mrb[21].mxu0  ;;  %v362_v20 = vadd.f32 %v361_v15, %v159_v18  ;;  %v452_v11 = vpop.permute.xlu1 %451 }
 0x108   :  { %v884_v19 = vpack.c.bf16 %v415_v14, %v413_v13  ;;  %v364_v22 = vadd.f32 %v363_v17, %v159_v18 }
 0x109   :  { %v416_v27 = vmax.f32 %v362_v20, 0.0 }
 0x10a   :  { %v367_v23 = vpop.f32.mrb[22].mxu0  ;;  %885 = vmatprep.subr.bf16.mxu0 %v884_v19  ;;  %920 = vmatprep.subr.bf16.mxu1 %v884_v19  ;;  %v417_v29 = vmax.f32 %v364_v22, 0.0 }
 0x10b   :  { %v368_v24 = vadd.f32 %v367_v23, %v164_v21  ;;  %v369_v25 = vpop.f32.mrb[23].mxu0  ;;  %887 = vmatpush1.bf16.msra.mxu0 %v886_v16  ;;  %928 = vmatpush1.bf16.msra.mxu1 %v886_v16 }
 0x10c   :  { %v370_v26 = vadd.f32 %v369_v25, %v164_v21 }
 0x10d   :  { %v418_v28 = vmax.f32 %v368_v24, 0.0 }
 0x10e   :  { %v419_v30 = vmax.f32 %v370_v26, 0.0  ;;  %v373_v31 = vpop.f32.mrb[24].mxu0 }
 0x10f   :  { %v890_v32 = vpack.c.bf16 %v418_v28, %v416_v27  ;;  %v375_v33 = vpop.f32.mrb[25].mxu0  ;;  %v374_v36 = vadd.f32 %v373_v31, %v169_v34  ;;  %v457_v27 = vpop.permute.xlu0 %456 }
 0x110   :  { %v888_v35 = vpack.c.bf16 %v419_v30, %v417_v29  ;;  %v376_v38 = vadd.f32 %v375_v33, %v169_v34  ;;  %v462_v30 = vpop.permute.xlu1 %461 }
 0x111   :  { %v420_v43 = vmax.f32 %v374_v36, 0.0 }
 0x112   :  { %v379_v39 = vpop.f32.mrb[26].mxu0  ;;  %889 = vmatprep.subr.bf16.mxu0 %v888_v35  ;;  %921 = vmatprep.subr.bf16.mxu1 %v888_v35  ;;  %v421_v45 = vmax.f32 %v376_v38, 0.0 }
 0x113   :  { %v380_v40 = vadd.f32 %v379_v39, %v174_v37  ;;  %v381_v41 = vpop.f32.mrb[27].mxu0  ;;  %891 = vmatpush1.bf16.msra.mxu0 %v890_v32  ;;  %929 = vmatpush1.bf16.msra.mxu1 %v890_v32 }
 0x114   :  { %v382_v42 = vadd.f32 %v381_v41, %v174_v37 }
 0x115   :  { %v422_v44 = vmax.f32 %v380_v40, 0.0 }
 0x116   :  { %v423_v46 = vmax.f32 %v382_v42, 0.0  ;;  %v385_v47 = vpop.f32.mrb[28].mxu0 }
 0x117   :  { %v894_v48 = vpack.c.bf16 %v422_v44, %v420_v43  ;;  %v387_v49 = vpop.f32.mrb[29].mxu0  ;;  %v386_v52 = vadd.f32 %v385_v47, %v179_v50  ;;  %v467_v43 = vpop.permute.xlu0 %466 }
 0x118   :  { %v892_v51 = vpack.c.bf16 %v423_v46, %v421_v45  ;;  %v388_v54 = vadd.f32 %v387_v49, %v179_v50  ;;  %v472_v46 = vpop.permute.xlu1 %471 }
 0x119   :  { %v424_v59 = vmax.f32 %v386_v52, 0.0 }
 0x11a   :  { %v391_v55 = vpop.f32.mrb[30].mxu0  ;;  %893 = vmatprep.subr.bf16.mxu0 %v892_v51  ;;  %922 = vmatprep.subr.bf16.mxu1 %v892_v51  ;;  %v425_v61 = vmax.f32 %v388_v54, 0.0 }
 0x11b   :  { %v392_v56 = vadd.f32 %v391_v55, %v184_v53  ;;  %v393_v57 = vpop.f32.mrb[31].mxu0  ;;  %895 = vmatpush1.bf16.msra.mxu0 %v894_v48  ;;  %930 = vmatpush1.bf16.msra.mxu1 %v894_v48 }
 0x11c   :  { %v394_v58 = vadd.f32 %v393_v57, %v184_v53 }
 0x11d   :  { %v426_v60 = vmax.f32 %v392_v56, 0.0 }
 0x11e   :  { %v427_v62 = vmax.f32 %v394_v58, 0.0 }
 0x11f   :  { %v898_v63 = vpack.c.bf16 %v426_v60, %v424_v59  ;;  %v477_v59 = vpop.permute.xlu0 %476 }
 0x120   :  { %v896_v0 = vpack.c.bf16 %v427_v62, %v425_v61  ;;  %v482_v62 = vpop.permute.xlu1 %481 }
 0x122   :  { %897 = vmatprep.subr.bf16.mxu0 %v896_v0  ;;  %923 = vmatprep.subr.bf16.mxu1 %v896_v0 }
 0x123   :  { %899 = vmatpush1.bf16.msra.mxu0 %v898_v63  ;;  %931 = vmatpush1.bf16.msra.mxu1 %v898_v63 }
 0x126   :  { %549 = vmatmul.mubr.f32.vlgmr.msra.gmra.mrb[32].mxu0 %v428_v1  ;;  %555 = vmatmul.mubr.f32.vlgmr.msra.gmra.mrb[0].mxu1 %v429_v2 }
 0x127   :  { %560 = vmatprep.mubr.f32.mxu1 %v937_v7 }
 0x12a   :  { %561 = vmatmul.mubr.f32.gmra.mrb[2].mxu1 %v430_v3 }
 0x12b   :  { %566 = vmatprep.mubr.f32.mxu1 %v937_v7 }
 0x12e   :  { %567 = vmatmul.mubr.f32.gmra.mrb[4].mxu1 %v431_v4 }
 0x12f   :  { %572 = vmatprep.mubr.f32.mxu1 %v937_v7 }
 0x132   :  { %573 = vmatmul.mubr.f32.gmra.mrb[6].mxu1 %v432_v5 }
 0x133   :  { %578 = vmatprep.mubr.f32.mxu1 %v937_v7 }
 0x136   :  { %579 = vmatmul.mubr.f32.gmra.mrb[8].mxu1 %v433_v6 }
 0x137   :  { %584 = vmatprep.mubr.f32.mxu1 %v937_v7 }
 0x13a   :  { %585 = vmatmul.mubr.f32.gmra.mrb[10].mxu1 %v434_v8 }
 0x13b   :  { %590 = vmatprep.mubr.f32.mxu1 %v937_v7 }
 0x13e   :  { %591 = vmatmul.mubr.f32.gmra.mrb[12].mxu1 %v435_v9 }
 0x13f   :  { %718 = vmatprep.mubr.f32.mxu1 %v937_v7 }
 0x1f9   :  { %v550_v12 = vpop.f32.mrb[32].mxu0  ;;  %v556_v13 = vpop.f32.mrb[0].mxu1 }
 0x1fa   :  { %v551_v14 = vadd.f32 %v550_v12, %v447_v10  ;;  %v557_v15 = vadd.f32 %v556_v13, %v452_v11  ;;  %v552_v16 = vpop.f32.mrb[33].mxu0  ;;  %v558_v17 = vpop.f32.mrb[1].mxu1  ;;  %v614_v12 = vld [vmem:[%s1215_s3 + $0x8] sm:$0xff]  ;;  %v615_v13 = vld [vmem:[%s1215_s3 + $0x10] sm:$0xff] }
 0x1fb   :  { %v553_v18 = vadd.f32 %v552_v16, %v447_v10  ;;  %v559_v19 = vadd.f32 %v558_v17, %v452_v11  ;;  %v613_v11 = vld [vmem:[%s1215_s3] sm:$0xff]  ;;  %v629_v16 = vpop.permute.xlu1 %628 }
 0x1fc   :  { %v597_v20 = vmax.f32 %v551_v14, 0.0  ;;  %v599_v21 = vmax.f32 %v557_v15, 0.0  ;;  %v616_v14 = vld [vmem:[%s1215_s3 + $0x18] sm:$0xff]  ;;  %v624_v15 = vpop.permute.xlu0 %623 }
 0x1fd   :  { %v598_v22 = vmax.f32 %v553_v18, 0.0  ;;  %v600_v23 = vmax.f32 %v559_v19, 0.0  ;;  %v562_v24 = vpop.f32.mrb[2].mxu1 }
 0x1fe   :  { %v902_v25 = vpack.c.bf16 %v599_v21, %v597_v20  ;;  %v564_v26 = vpop.f32.mrb[3].mxu1  ;;  %v563_v29 = vadd.f32 %v562_v24, %v457_v27 }
 0x1ff   :  { %v900_v28 = vpack.c.bf16 %v600_v23, %v598_v22  ;;  %v565_v31 = vadd.f32 %v564_v26, %v457_v27  ;;  %v639_v21 = vpop.permute.xlu1 %638 }
 0x200   :  { %v601_v36 = vmax.f32 %v563_v29, 0.0  ;;  %v634_v17 = vpop.permute.xlu0 %633 }
 0x201   :  { %v568_v32 = vpop.f32.mrb[4].mxu1  ;;  %901 = vmatprep.subr.bf16.mxu1 %v900_v28  ;;  %v602_v38 = vmax.f32 %v565_v31, 0.0 }
 0x202   :  { %v569_v33 = vadd.f32 %v568_v32, %v462_v30  ;;  %v570_v34 = vpop.f32.mrb[5].mxu1  ;;  %903 = vmatpush1.bf16.msra.mxu1 %v902_v25 }
 0x203   :  { %v571_v35 = vadd.f32 %v570_v34, %v462_v30  ;;  %v763_v30 = vpop.permute.xlu1 %762 }
 0x204   :  { %v603_v37 = vmax.f32 %v569_v33, 0.0  ;;  %v758_v27 = vpop.permute.xlu0 %757 }
 0x205   :  { %v604_v39 = vmax.f32 %v571_v35, 0.0  ;;  %v574_v40 = vpop.f32.mrb[6].mxu1 }
 0x206   :  { %v906_v41 = vpack.c.bf16 %v603_v37, %v601_v36  ;;  %v576_v42 = vpop.f32.mrb[7].mxu1  ;;  %v575_v45 = vadd.f32 %v574_v40, %v467_v43 }
 0x207   :  { %v904_v44 = vpack.c.bf16 %v604_v39, %v602_v38  ;;  %v577_v47 = vadd.f32 %v576_v42, %v467_v43 }
 0x208   :  { %v605_v52 = vmax.f32 %v575_v45, 0.0  ;;  %v768_v42 = vpop.permute.xlu0 %767 }
 0x209   :  { %v580_v48 = vpop.f32.mrb[8].mxu1  ;;  %905 = vmatprep.subr.bf16.mxu1 %v904_v44  ;;  %v606_v54 = vmax.f32 %v577_v47, 0.0 }
 0x20a   :  { %v581_v49 = vadd.f32 %v580_v48, %v472_v46  ;;  %v582_v50 = vpop.f32.mrb[9].mxu1  ;;  %907 = vmatpush1.bf16.msra.mxu1 %v906_v41 }
 0x20b   :  { %v583_v51 = vadd.f32 %v582_v50, %v472_v46 }
 0x20c   :  { %v607_v53 = vmax.f32 %v581_v49, 0.0 }
 0x20d   :  { %v608_v55 = vmax.f32 %v583_v51, 0.0  ;;  %v586_v56 = vpop.f32.mrb[10].mxu1 }
 0x20e   :  { %v910_v57 = vpack.c.bf16 %v607_v53, %v605_v52  ;;  %v588_v58 = vpop.f32.mrb[11].mxu1  ;;  %v587_v61 = vadd.f32 %v586_v56, %v477_v59  ;;  %v773_v53 = vpop.permute.xlu1 %772 }
 0x20f   :  { %v908_v60 = vpack.c.bf16 %v608_v55, %v606_v54  ;;  %v589_v63 = vadd.f32 %v588_v58, %v477_v59 }
 0x210   :  { %v609_v4 = vmax.f32 %v587_v61, 0.0 }
 0x211   :  { %v592_v0 = vpop.f32.mrb[12].mxu1  ;;  %909 = vmatprep.subr.bf16.mxu1 %v908_v60  ;;  %v610_v6 = vmax.f32 %v589_v63, 0.0 }
 0x212   :  { %v593_v1 = vadd.f32 %v592_v0, %v482_v62  ;;  %v594_v2 = vpop.f32.mrb[13].mxu1  ;;  %911 = vmatpush1.bf16.msra.mxu1 %v910_v57 }
 0x213   :  { %v595_v3 = vadd.f32 %v594_v2, %v482_v62  ;;  %v939_v2 = vmov 1966171168  }
 0x214   :  { %v611_v5 = vmax.f32 %v593_v1, 0.0 }
 0x215   :  { %v612_v8 = vmax.f32 %v595_v3, 0.0  ;;  %v813_v3 = vunpack.c.l.s4 %v939_v2 }
 0x216   :  { %v914_v9 = vpack.c.bf16 %v611_v5, %v609_v4  ;;  %v815_v4 = vlaneseq }
 0x217   :  { %v912_v10 = vpack.c.bf16 %v612_v8, %v610_v6 }
 0x218   :  { %vm829_vm2 = vcmp.lt.s32.totalorder %v815_v4, 256 }
 0x219   :  { %913 = vmatprep.subr.bf16.mxu1 %v912_v10  ;;  %v814_v10 = vunpack.c.0.s8 %v813_v3 }
 0x21a   :  { %915 = vmatpush1.bf16.msra.mxu1 %v914_v9 }
 0x21d   :  { %856 = vmatmul.mubr.msk.f32.vlgmr.msra.gmra.mrb[14].mxu1 %vm641_vm1, %v613_v11  ;;  %v816_v11 = vshrl.u32 %v815_v4, 7 }
 0x21e   :  { %724 = vmatprep.mubr.f32.mxu1 %v937_v7 }
 0x221   :  { %857 = vmatmul.mubr.msk.f32.gmra.mrb[16].mxu1 %vm641_vm1, %v614_v12 }
 0x222   :  { %730 = vmatprep.mubr.f32.mxu1 %v937_v7 }
 0x225   :  { %858 = vmatmul.mubr.msk.f32.gmra.mrb[18].mxu1 %vm641_vm1, %v615_v13  ;;  %v805_v13 = vpop.permute.xlu0 %804 }
 0x226   :  { %736 = vmatprep.mubr.f32.mxu1 %v937_v7 }
 0x229   :  { %859 = vmatmul.mubr.msk.f32.gmra.mrb[20].mxu1 %vm641_vm1, %v616_v14 }
 0x2f0   :  { %v720_v18 = vpop.f32.mrb[14].mxu1 }
 0x2f1   :  { %v721_v19 = vadd.f32 %v720_v18, %v624_v15  ;;  %v722_v20 = vpop.f32.mrb[15].mxu1 }
 0x2f2   :  { %v723_v22 = vadd.f32 %v722_v20, %v624_v15 }
 0x2f3   :  { %v743_v24 = vmax.f32 %v721_v19, 0.0 }
 0x2f4   :  { %v726_v23 = vpop.f32.mrb[16].mxu1  ;;  %v744_v28 = vmax.f32 %v723_v22, 0.0 }
 0x2f5   :  { %v727_v25 = vadd.f32 %v726_v23, %v629_v16  ;;  %v728_v26 = vpop.f32.mrb[17].mxu1  ;;  %v775_v33 = vmul.f32 %v758_v27, %v743_v24 }
 0x2f6   :  { %v729_v7 = vadd.f32 %v728_v26, %v629_v16  ;;  %v776_v37 = vmul.f32 %v758_v27, %v744_v28 }
 0x2f7   :  { %v745_v29 = vmax.f32 %v727_v25, 0.0 }
 0x2f8   :  { %v746_v31 = vmax.f32 %v729_v7, 0.0  ;;  %v732_v32 = vpop.f32.mrb[18].mxu1 }
 0x2f9   :  { %v777_v34 = vmul.f32 %v763_v30, %v745_v29  ;;  %v733_v35 = vadd.f32 %v732_v32, %v634_v17  ;;  %v734_v36 = vpop.f32.mrb[19].mxu1 }
 0x2fa   :  { %v778_v38 = vmul.f32 %v763_v30, %v746_v31  ;;  %v735_v39 = vadd.f32 %v734_v36, %v634_v17  ;;  %v817_v17 = vsub.s32 %v814_v10, %v816_v11 }
 0x2fb   :  { %v783_v40 = vadd.f32 %v777_v34, %v775_v33  ;;  %v747_v41 = vmax.f32 %v733_v35, 0.0 }
 0x2fc   :  { %v792_v43 = vadd.f32 %v778_v38, %v776_v37  ;;  %v748_v44 = vmax.f32 %v735_v39, 0.0  ;;  %v738_v45 = vpop.f32.mrb[20].mxu1 }
 0x2fd   :  { %v779_v46 = vmul.f32 %v768_v42, %v747_v41  ;;  %v739_v47 = vadd.f32 %v738_v45, %v639_v21  ;;  %v740_v48 = vpop.f32.mrb[21].mxu1 }
 0x2fe   :  { %v780_v49 = vmul.f32 %v768_v42, %v748_v44  ;;  %v741_v50 = vadd.f32 %v740_v48, %v639_v21 }
 0x2ff   :  { %v784_v51 = vadd.f32 %v783_v40, %v779_v46  ;;  %v749_v52 = vmax.f32 %v739_v47, 0.0 }
 0x300   :  { %v793_v54 = vadd.f32 %v792_v43, %v780_v49  ;;  %v750_v55 = vmax.f32 %v741_v50, 0.0 }
 0x301   :  { %v781_v56 = vmul.f32 %v773_v53, %v749_v52 }
 0x302   :  { %v782_v57 = vmul.f32 %v773_v53, %v750_v55 }
 0x303   :  { %v785_v58 = vadd.f32 %v784_v51, %v781_v56 }
 0x304   :  { %v794_v59 = vadd.f32 %v793_v54, %v782_v57 }
 0x305   :  { %v786_v60 = vrot.slane %v785_v58, 4 }
 0x306   :  { %v795_v61 = vrot.slane %v794_v59, 4 }
 0x307   :  { %v787_v62 = vadd.f32 %v786_v60, %v785_v58 }
 0x308   :  { %v796_v63 = vadd.f32 %v795_v61, %v794_v59 }
 0x309   :  { %v788_v0 = vrot.slane %v787_v62, 2 }
 0x30a   :  { %v797_v1 = vrot.slane %v796_v63, 2 }
 0x30b   :  { %v789_v5 = vadd.f32 %v788_v0, %v787_v62 }
 0x30c   :  { %v798_v6 = vadd.f32 %v797_v1, %v796_v63 }
 0x30d   :  { %v790_v8 = vrot.slane %v789_v5, 1 }
 0x30e   :  { %v799_v9 = vrot.slane %v798_v6, 1 }
 0x30f   :  { %v791_v12 = vadd.f32 %v790_v8, %v789_v5 }
 0x310   :  { %v800_v14 = vadd.f32 %v799_v9, %v798_v6 }
 0x311   :  { %v807_v15 = vadd.f32 %v805_v13, %v791_v12 }
 0x312   :  { %v808_v16 = vadd.f32 %v805_v13, %v800_v14 }
 0x314   :  { %v811_v18 = vcombine.low %v807_v15, %v808_v16 }
 0x316   :  { %v818_v19 = vrot.slane %v811_v18, %v817_v17 }
 0x318   :  { %v825_v20 = vrot.slane %v818_v19, %v817_v17 }
 0x31a   :  { %831 = vst.msk [vmem:[%s1217_s5] sm:$0x3] %vm829_vm2, %v825_v20 }

</bundles_post_ra>
